<compile_context>
chip_gen: v7x
topology: tpu7x:2x2x1
jax: 0.10.0
libtpu: 0.0.40
codegen_flags: <defaults>
</compile_context>

<pallas_src>
import math
import jax
import jax.numpy as jnp
from jax.experimental import pallas as pl
from jax.experimental.pallas import tpu as pltpu


def _time_pos_emb_kernel(x_ref, invf_ref, w1_ref, b1_ref, w2_ref, b2_ref, o_ref):
    # x_ref:    [tm, 1]        f32 timesteps (sublane-dense; lane-dense layout
    #                          would only save a cross-lane broadcast, <1%)
    # invf_ref: [1, half_dim]  f32 inverse frequencies (freq_scale pre-folded)
    # w1_ref:   [freq_dim, emb_dim] bf16,  b1_ref: [1, emb_dim] f32
    # w2_ref:   [emb_dim, emb_dim]  bf16,  b2_ref: [1, emb_dim] f32
    # o_ref:    [tm, emb_dim]  f32
    half_dim = invf_ref.shape[1]

    pos = x_ref[...].astype(jnp.float32)          # [tm, 1]
    emb = pos * invf_ref[...]                     # [tm, half_dim]

    # sin/cos in f32 on the EUP, cast to bf16 only for the MXU operands.
    sin_bf = jnp.sin(emb).astype(jnp.bfloat16)
    cos_bf = jnp.cos(emb).astype(jnp.bfloat16)

    # Two K=half_dim dots instead of concat + one K=freq_dim dot (no concat
    # copy; static ref slices are free views).
    w1_sin = w1_ref[0:half_dim, :]
    w1_cos = w1_ref[half_dim:2 * half_dim, :]
    h = (jnp.dot(sin_bf, w1_sin, preferred_element_type=jnp.float32)
         + jnp.dot(cos_bf, w1_cos, preferred_element_type=jnp.float32)
         + b1_ref[...])                           # f32 bias

    h = h * jax.nn.sigmoid(h)                     # SiLU in f32 (EUP)

    out = jnp.dot(h.astype(jnp.bfloat16), w2_ref[...],
                  preferred_element_type=jnp.float32) + b2_ref[...]
    o_ref[...] = out.astype(o_ref.dtype)


def prepare_time_pos_emb_params(inv_freq, freq_scale, w1, b1, w2, b2):
    """Call ONCE at parameter-init time. Returns kernel-ready params so the
    per-step call does zero re-casting / re-reading of the f32 weights.

    Weights are stored [in_features, out_features] (y = x @ W + b, i.e.
    W = W_torch.T).
    """
    half_dim = inv_freq.shape[0]
    emb_dim = w1.shape[1]
    return dict(
        invf=(inv_freq.astype(jnp.float32)
              * jnp.float32(freq_scale)).reshape(1, half_dim),
        w1=w1.astype(jnp.bfloat16),
        b1=b1.reshape(1, emb_dim).astype(jnp.float32),
        w2=w2.astype(jnp.bfloat16),
        b2=b2.reshape(1, emb_dim).astype(jnp.float32),
    )


def time_positional_embedding(x, params, *, out_dtype=jnp.float32):
    """x: [M] float timesteps -> [M, emb_dim] embedding (default f32)."""
    invf = params["invf"]
    w1, b1, w2, b2 = params["w1"], params["b1"], params["w2"], params["b2"]

    M = x.shape[0]
    half_dim = invf.shape[1]
    freq_dim, emb_dim = w1.shape

    # Pad M to a sublane multiple; for many timesteps use 256-row tiles (full
    # MXU height on v6e/v7x) and iterate a 1-D grid with weights resident.
    m_pad = max(8, ((M + 7) // 8) * 8)
    tile_m = min(256, m_pad)
    m_pad = ((m_pad + tile_m - 1) // tile_m) * tile_m
    grid_m = m_pad // tile_m

    x2d = jnp.pad(x.astype(jnp.float32), (0, m_pad - M)).reshape(m_pad, 1)

    # Advisory cost: two-layer MLP matmuls, sin/cos + sigmoid transcendentals,
    # bf16 weights fetched once, f32 biases, output store.
    flops = 2 * m_pad * freq_dim * emb_dim + 2 * m_pad * emb_dim * emb_dim
    transcendentals = m_pad * (freq_dim + emb_dim)
    bytes_accessed = (
        m_pad * 4 + half_dim * 4
        + (freq_dim * emb_dim + emb_dim * emb_dim) * 2     # bf16 weights (once)
        + 2 * emb_dim * 4                                  # f32 biases
        + m_pad * emb_dim * jnp.dtype(out_dtype).itemsize  # output
    )
    cost = pl.CostEstimate(flops=flops, transcendentals=transcendentals,
                           bytes_accessed=bytes_accessed)

    out = pl.pallas_call(
        _time_pos_emb_kernel,
        out_shape=jax.ShapeDtypeStruct((m_pad, emb_dim), out_dtype),
        grid=(grid_m,),
        in_specs=[
            pl.BlockSpec((tile_m, 1), lambda i: (i, 0)),          # timesteps
            pl.BlockSpec((1, half_dim), lambda i: (0, 0)),        # inv_freq (resident)
            pl.BlockSpec((freq_dim, emb_dim), lambda i: (0, 0)),  # w1 (resident)
            pl.BlockSpec((1, emb_dim), lambda i: (0, 0)),         # b1 (resident)
            pl.BlockSpec((emb_dim, emb_dim), lambda i: (0, 0)),   # w2 (resident)
            pl.BlockSpec((1, emb_dim), lambda i: (0, 0)),         # b2 (resident)
        ],
        out_specs=pl.BlockSpec((tile_m, emb_dim), lambda i: (i, 0)),
        compiler_params=pltpu.CompilerParams(
            dimension_semantics=("parallel",)),  # v7x: 2 TCs split the M tiles
        cost_estimate=cost,
    )(x2d, invf, w1, b1, w2, b2)

    return out[:M]


def reference_f32(x, inv_freq, freq_scale, w1, b1, w2, b2):
    # Faithful to the PyTorch module (full f32).
    pos = x.astype(jnp.float32)
    emb = pos[:, None] * freq_scale * inv_freq[None, :]
    freq = jnp.concatenate([jnp.sin(emb), jnp.cos(emb)], axis=-1)
    h = freq @ w1 + b1
    h = h * jax.nn.sigmoid(h)
    return h @ w2 + b2


def reference_bf16(x, inv_freq, freq_scale, w1, b1, w2, b2):
    # Same bf16 rounding as the kernel: bf16 weights / MXU inputs, f32
    # accumulation, f32 biases, split first dot.
    half = inv_freq.shape[0]
    pos = x.astype(jnp.float32)
    emb = pos[:, None] * (jnp.float32(freq_scale) * inv_freq.astype(jnp.float32))[None, :]
    sin_bf = jnp.sin(emb).astype(jnp.bfloat16)
    cos_bf = jnp.cos(emb).astype(jnp.bfloat16)
    w1_bf = w1.astype(jnp.bfloat16)
    h = (jnp.dot(sin_bf, w1_bf[:half], preferred_element_type=jnp.float32)
         + jnp.dot(cos_bf, w1_bf[half:], preferred_element_type=jnp.float32)
         + b1.astype(jnp.float32))
    h = h * jax.nn.sigmoid(h)
    out = jnp.dot(h.astype(jnp.bfloat16), w2.astype(jnp.bfloat16),
                  preferred_element_type=jnp.float32) + b2.astype(jnp.float32)
    return out


if __name__ == "__main__":
    # Module hyper-params (defaults of TimePositionalEmbedding, with_steps=False)
    freq_dim = 256
    emb_dim = 512
    theta = 1000.0
    freq_scale = 1000.0
    B = 8  # small batch of timesteps

    half_dim = freq_dim // 2
    freq_seq = jnp.arange(half_dim, dtype=jnp.float32) / half_dim
    inv_freq = theta ** (-freq_seq)

    key = jax.random.PRNGKey(0)
    k_x, k_w1, k_b1, k_w2, k_b2 = jax.random.split(key, 5)

    # Deterministic synthetic parameters (stored as [in, out] for y = x @ W + b)
    w1 = jax.random.normal(k_w1, (freq_dim, emb_dim), jnp.float32) / math.sqrt(freq_dim)
    b1 = jax.random.normal(k_b1, (emb_dim,), jnp.float32) * 0.01
    w2 = jax.random.normal(k_w2, (emb_dim, emb_dim), jnp.float32) / math.sqrt(emb_dim)
    b2 = jax.random.normal(k_b2, (emb_dim,), jnp.float32) * 0.01

    # One-time param prep: bf16 weights, f32 biases, freq_scale folded.
    params = prepare_time_pos_emb_params(inv_freq, freq_scale, w1, b1, w2, b2)

    # --- single-shot path (small M, grid collapses to one block) ---
    x = jax.random.uniform(k_x, (B,), jnp.float32)
    out = jax.block_until_ready(time_positional_embedding(x, params))
    assert out.shape == (B, emb_dim)

    ref_bf = reference_bf16(x, inv_freq, freq_scale, w1, b1, w2, b2)
    assert jnp.allclose(out, ref_bf, atol=1e-2, rtol=1e-2)
    ref_f32 = reference_f32(x, inv_freq, freq_scale, w1, b1, w2, b2)
    assert jnp.allclose(out, ref_f32, atol=5e-2, rtol=5e-2)

    # --- batched-timesteps path (exercises the gridded, weight-resident case
    #     with M padding: M=300 -> tiles of 256, grid of 2) ---
    x_big = jax.random.uniform(jax.random.PRNGKey(1), (300,), jnp.float32)
    out_big = jax.block_until_ready(time_positional_embedding(x_big, params))
    assert out_big.shape == (300, emb_dim)
    ref_big = reference_bf16(x_big, inv_freq, freq_scale, w1, b1, w2, b2)
    assert jnp.allclose(out_big, ref_big, atol=1e-2, rtol=1e-2)

    print("KERNEL_OK")
</pallas_src>

<mosaic_0001>
module attributes {stable_mosaic.version = 11 : i64} {
  func.func @_time_pos_emb_kernel(%arg0: i32, %arg1: memref<8x1xf32, #tpu.memory_space<vmem>>, %arg2: memref<1x128xf32, #tpu.memory_space<vmem>>, %arg3: memref<256x512xbf16, #tpu.memory_space<vmem>>, %arg4: memref<1x512xf32, #tpu.memory_space<vmem>>, %arg5: memref<512x512xbf16, #tpu.memory_space<vmem>>, %arg6: memref<1x512xf32, #tpu.memory_space<vmem>>, %arg7: memref<8x512xf32, #tpu.memory_space<vmem>>) attributes {dimension_semantics = [#tpu.dimension_semantics<parallel>], iteration_bounds = array<i64: 1>, scalar_prefetch = 0 : i64, scratch_operands = 0 : i64, tpu.core_type = #tpu.core_type<tc>, window_params = [{transform_indices = @transform_0, window_bounds = array<i64: 8, 1>}, {pipeline_mode = #tpu.pipeline_mode<synchronous>, transform_indices = @transform_1, window_bounds = array<i64: 1, 128>}, {pipeline_mode = #tpu.pipeline_mode<synchronous>, transform_indices = @transform_2, window_bounds = array<i64: 256, 512>}, {pipeline_mode = #tpu.pipeline_mode<synchronous>, transform_indices = @transform_3, window_bounds = array<i64: 1, 512>}, {pipeline_mode = #tpu.pipeline_mode<synchronous>, transform_indices = @transform_4, window_bounds = array<i64: 512, 512>}, {pipeline_mode = #tpu.pipeline_mode<synchronous>, transform_indices = @transform_5, window_bounds = array<i64: 1, 512>}, {transform_indices = @transform_6, window_bounds = array<i64: 8, 512>}]} {
    %c0 = arith.constant 0 : index
    %c0_0 = arith.constant 0 : index
    %0 = vector.load %arg1[%c0, %c0_0] : memref<8x1xf32, #tpu.memory_space<vmem>>, vector<8x1xf32>
    %c0_1 = arith.constant 0 : index
    %c0_2 = arith.constant 0 : index
    %1 = vector.load %arg2[%c0_1, %c0_2] : memref<1x128xf32, #tpu.memory_space<vmem>>, vector<1x128xf32>
    %2 = vector.broadcast %0 : vector<8x1xf32> to vector<8x128xf32>
    %3 = vector.broadcast %1 : vector<1x128xf32> to vector<8x128xf32>
    %4 = arith.mulf %2, %3 : vector<8x128xf32>
    %5 = math.sin %4 : vector<8x128xf32>
    %6 = arith.truncf %5 : vector<8x128xf32> to vector<8x128xbf16>
    %7 = math.cos %4 : vector<8x128xf32>
    %8 = arith.truncf %7 : vector<8x128xf32> to vector<8x128xbf16>
    %c0_3 = arith.constant 0 : index
    %c0_4 = arith.constant 0 : index
    %9 = vector.load %arg3[%c0_3, %c0_4] : memref<256x512xbf16, #tpu.memory_space<vmem>>, vector<128x512xbf16>
    %c128 = arith.constant 128 : index
    %c0_5 = arith.constant 0 : index
    %10 = vector.load %arg3[%c128, %c0_5] : memref<256x512xbf16, #tpu.memory_space<vmem>>, vector<128x512xbf16>
    %cst = arith.constant dense<0.000000e+00> : vector<8x512xf32>
    %11 = tpu.matmul %6, %9, %cst {dimension_numbers = #tpu.dot_dimension_numbers<[1], [0], [0], [1], [0, 0, 1, 1], [], []>} : vector<8x128xbf16>, vector<128x512xbf16>, vector<8x512xf32> -> vector<8x512xf32>
    %cst_6 = arith.constant dense<0.000000e+00> : vector<8x512xf32>
    %12 = tpu.matmul %8, %10, %cst_6 {dimension_numbers = #tpu.dot_dimension_numbers<[1], [0], [0], [1], [0, 0, 1, 1], [], []>} : vector<8x128xbf16>, vector<128x512xbf16>, vector<8x512xf32> -> vector<8x512xf32>
    %13 = arith.addf %11, %12 : vector<8x512xf32>
    %c0_7 = arith.constant 0 : index
    %c0_8 = arith.constant 0 : index
    %14 = vector.load %arg4[%c0_7, %c0_8] : memref<1x512xf32, #tpu.memory_space<vmem>>, vector<1x512xf32>
    %15 = vector.broadcast %14 : vector<1x512xf32> to vector<8x512xf32>
    %16 = arith.addf %13, %15 : vector<8x512xf32>
    %17 = arith.negf %16 : vector<8x512xf32>
    %18 = math.exp %17 : vector<8x512xf32>
    %cst_9 = arith.constant 1.000000e+00 : f32
    %19 = vector.broadcast %cst_9 : f32 to vector<8x512xf32>
    %20 = arith.addf %19, %18 : vector<8x512xf32>
    %21 = arith.divf %19, %20 : vector<8x512xf32>
    %22 = arith.mulf %16, %21 : vector<8x512xf32>
    %23 = arith.truncf %22 : vector<8x512xf32> to vector<8x512xbf16>
    %c0_10 = arith.constant 0 : index
    %c0_11 = arith.constant 0 : index
    %24 = vector.load %arg5[%c0_10, %c0_11] : memref<512x512xbf16, #tpu.memory_space<vmem>>, vector<512x512xbf16>
    %cst_12 = arith.constant dense<0.000000e+00> : vector<8x512xf32>
    %25 = tpu.matmul %23, %24, %cst_12 {dimension_numbers = #tpu.dot_dimension_numbers<[1], [0], [0], [1], [0, 0, 1, 1], [], []>} : vector<8x512xbf16>, vector<512x512xbf16>, vector<8x512xf32> -> vector<8x512xf32>
    %c0_13 = arith.constant 0 : index
    %c0_14 = arith.constant 0 : index
    %26 = vector.load %arg6[%c0_13, %c0_14] : memref<1x512xf32, #tpu.memory_space<vmem>>, vector<1x512xf32>
    %27 = vector.broadcast %26 : vector<1x512xf32> to vector<8x512xf32>
    %28 = arith.addf %25, %27 : vector<8x512xf32>
    %c0_15 = arith.constant 0 : index
    %c0_16 = arith.constant 0 : index
    %29 = vector.load %arg7[%c0_15, %c0_16] : memref<8x512xf32, #tpu.memory_space<vmem>>, vector<8x512xf32>
    tpu.vector_store %arg7[%c0_15, %c0_16], %28 {strides = array<i32>} : memref<8x512xf32, #tpu.memory_space<vmem>>, vector<8x512xf32>,
    return
  }
  func.func @transform_0(%arg0: i32) -> (i32, i32) {
    %c0_i32 = arith.constant 0 : i32
    %c0_i32_0 = arith.constant 0 : i32
    return %arg0, %c0_i32 : i32, i32
  }
  func.func @transform_1(%arg0: i32) -> (i32, i32) {
    %c0_i32 = arith.constant 0 : i32
    %c0_i32_0 = arith.constant 0 : i32
    %c0_i32_1 = arith.constant 0 : i32
    return %c0_i32, %c0_i32_0 : i32, i32
  }
  func.func @transform_2(%arg0: i32) -> (i32, i32) {
    %c0_i32 = arith.constant 0 : i32
    %c0_i32_0 = arith.constant 0 : i32
    %c0_i32_1 = arith.constant 0 : i32
    return %c0_i32, %c0_i32_0 : i32, i32
  }
  func.func @transform_3(%arg0: i32) -> (i32, i32) {
    %c0_i32 = arith.constant 0 : i32
    %c0_i32_0 = arith.constant 0 : i32
    %c0_i32_1 = arith.constant 0 : i32
    return %c0_i32, %c0_i32_0 : i32, i32
  }
  func.func @transform_4(%arg0: i32) -> (i32, i32) {
    %c0_i32 = arith.constant 0 : i32
    %c0_i32_0 = arith.constant 0 : i32
    %c0_i32_1 = arith.constant 0 : i32
    return %c0_i32, %c0_i32_0 : i32, i32
  }
  func.func @transform_5(%arg0: i32) -> (i32, i32) {
    %c0_i32 = arith.constant 0 : i32
    %c0_i32_0 = arith.constant 0 : i32
    %c0_i32_1 = arith.constant 0 : i32
    return %c0_i32, %c0_i32_0 : i32, i32
  }
  func.func @transform_6(%arg0: i32) -> (i32, i32) {
    %c0_i32 = arith.constant 0 : i32
    %c0_i32_0 = arith.constant 0 : i32
    return %arg0, %c0_i32 : i32, i32
  }
}

</mosaic_0001>

<bundles_post_ra>
// kernel: tpu_custom_call.1
= control target key start
LH: loop header
LB: loop body
LE: loop exit
PB: predicated region body
PF: predicated region fallthrough
CT: control target
= control target key end

     0   :  { %11 = vsyncpa [#allocation3], 0  ;;  %s2639_s0 = inlined_call_operand.vmem [shape: f32[8,1], index: 0, kind: input, shape index: {}]   ;;  %s2640_s1 = inlined_call_operand.vmem [shape: f32[1,128], index: 1, kind: input, shape index: {}]   ;;  %s2641_s2 = inlined_call_operand.hbm [shape: bf16[256,512], index: 2, kind: input, shape index: {}]   ;;  %s2642_s3 = inlined_call_operand.vmem [shape: f32[1,512], index: 3, kind: input, shape index: {}]   ;;  %s2643_s4 = inlined_call_operand.hbm [shape: bf16[512,512], index: 4, kind: input, shape index: {}]   ;;  %s2644_s5 = inlined_call_operand.vmem [shape: f32[1,512], index: 5, kind: input, shape index: {}]   ;;  %s2645_s6 = inlined_call_operand.hbm [shape: f32[8,512], index: 6, kind: output, shape index: {}]  }
   0x1   :  { %12 = vsyncpa [#allocation6], 0 }
   0x2   :  { %13 = vsyncpa [#allocation4], 0  ;;  %s2470_s21 = smov [#allocation2]   ;;  %s2398_s25 = scalar_lea.hbm %s2641_s2, 8192 }
   0x3   :  { %s23_s22 = sshll.u32 %s2470_s21, 4  ;;  %p2399_p0 = scmp.ne.s32.totalorder %s2641_s2, %s2398_s25  ;;  %s24_s22 = int_to_ptr.vmem [resolvable:$true] %s23_s22 }
   0x4   :  { %p2402_p1 = scmp.lt.u32.totalorder %s2398_s25, %s2641_s2 }
   0x6   :  { %p2404_p2 = pnand %p2402_p1, %p2399_p0 }
   0x8   :  { %2407 = shalt.err (!%p2404_p2)
}
   0x9   :  { %s2408_s30 = scalar_lea.vmem %s24_s22, 8192  ;;  %p2413_p4 = scmp.lt.s32.totalorder %s24_s22, %s24_s22 }
   0xa   :  { %p2409_p3 = scmp.ne.s32.totalorder %s24_s22, %s2408_s30  ;;  %p2414_p5 = scmp.lt.s32.totalorder %s2408_s30, %s2408_s30 }
   0xc   :  { %p2415_p6 = por %p2414_p5, %p2413_p4 }
   0xe   :  { %p2416_p7 = pnand %p2415_p6, %p2409_p3 }
  0x10   :  { %2419 = shalt.err (!%p2416_p7)
}
  0x11   :  { %s2471_s7 = smov 256   ;;  %s2472_s8 = smov 16  }
  0x12   :  { %29 = dma.hbm_to_vmem [thread:$0]  %s2641_s2, 8192, %s24_s22, [#allocation3], %s2471_s7, %s2471_s7, %s2472_s8  }
  0x13   :  { %s2473_s11 = smov [#allocation5]   ;;  %s2420_s15 = scalar_lea.hbm %s2643_s4, 16384 }
  0x14   :  { %s37_s12 = sshll.u32 %s2473_s11, 4  ;;  %p2421_p8 = scmp.ne.s32.totalorder %s2643_s4, %s2420_s15  ;;  %s38_s12 = int_to_ptr.vmem [resolvable:$true] %s37_s12 }
  0x15   :  { %p2424_p9 = scmp.lt.u32.totalorder %s2420_s15, %s2643_s4 }
  0x17   :  { %p2426_p10 = pnand %p2424_p9, %p2421_p8 }
  0x19   :  { %2429 = shalt.err (!%p2426_p10)
}
  0x1a   :  { %s2430_s20 = scalar_lea.vmem %s38_s12, 16384  ;;  %p2435_p12 = scmp.lt.s32.totalorder %s38_s12, %s38_s12 }
  0x1b   :  { %p2431_p11 = scmp.ne.s32.totalorder %s38_s12, %s2430_s20  ;;  %p2436_p13 = scmp.lt.s32.totalorder %s2430_s20, %s2430_s20 }
  0x1d   :  { %p2437_p0 = por %p2436_p13, %p2435_p12 }
  0x1f   :  { %p2438_p1 = pnand %p2437_p0, %p2431_p11 }
  0x21   :  { %2441 = shalt.err (!%p2438_p1)
}
  0x22   :  { %43 = dma.hbm_to_vmem [thread:$0]  %s2643_s4, 16384, %s38_s12, [#allocation6], %s2471_s7, %s2471_s7, %s2472_s8  }
  0x23   :  { %2464 = dma.done.wait [#allocation3], 8192  }
  0x24   :  { %2465 = vsyncadd [#allocation3], 4294959104 }
  0x25   :  { %2466 = dma.done.wait [#allocation6], 16384  }
  0x26   :  { %2467 = vsyncadd [#allocation6], 4294950912  ;;  %v2474_v0 = vmov 0   ;;  %v53_v1 = vld [vmem:[%s2639_s0] sm:$0xff]  ;;  %v2092_v3 = vld [vmem:[#allocation2 + $0x10c] ss:$16 sps:$4 sm:$0xff]  }
  0x27   :  { %2089 = vset.pattern.permute.xlu0 %v2474_v0  ;;  %532 = vmatprep.mubr.bf16.mxu0 %v2474_v0  ;;  %v2090_v2 = vld [vmem:[#allocation2 + $0x104] ss:$16 sps:$4 sm:$0xff]   ;;  %v2094_v4 = vld [vmem:[#allocation2 + $0x100] ss:$16 sps:$4 sm:$0xff]   ;;  %v2095_v5 = vld [vmem:[#allocation2 + $0x108] ss:$16 sps:$4 sm:$0xff]  }
  0x28   :  { %573 = vmatprep.mubr.bf16.mxu1 %v2474_v0  ;;  %57 = vperm.xlu0 %2089, %v53_v1   ;;  %v2096_v6 = vld [vmem:[#allocation2 + $0x124] ss:$16 sps:$4 sm:$0xff]   ;;  %v2098_v7 = vld [vmem:[#allocation2 + $0x12c] ss:$16 sps:$4 sm:$0xff]   ;;  %v2100_v8 = vld [vmem:[#allocation2 + $0x120] ss:$16 sps:$4 sm:$0xff]  }
  0x29   :  { %500 = vmatprep.subr.bf16.mxu0 %v2090_v2  ;;  %541 = vmatprep.subr.bf16.mxu1 %v2092_v3  ;;  %v2101_v9 = vld [vmem:[#allocation2 + $0x128] ss:$16 sps:$4 sm:$0xff]   ;;  %v2102_v10 = vld [vmem:[#allocation2 + $0x144] ss:$16 sps:$4 sm:$0xff]   ;;  %v2104_v11 = vld [vmem:[#allocation2 + $0x14c] ss:$16 sps:$4 sm:$0xff]  }
  0x2a   :  { %501 = vmatpush1.bf16.msra.mxu0 %v2094_v4  ;;  %542 = vmatpush1.bf16.msra.mxu1 %v2095_v5  ;;  %v2106_v12 = vld [vmem:[#allocation2 + $0x140] ss:$16 sps:$4 sm:$0xff]   ;;  %v2107_v13 = vld [vmem:[#allocation2 + $0x148] ss:$16 sps:$4 sm:$0xff]   ;;  %v2108_v14 = vld [vmem:[#allocation2 + $0x164] ss:$16 sps:$4 sm:$0xff]  }
  0x2b   :  { %502 = vmatprep.subr.bf16.mxu0 %v2096_v6  ;;  %543 = vmatprep.subr.bf16.mxu1 %v2098_v7  ;;  %v2110_v15 = vld [vmem:[#allocation2 + $0x16c] ss:$16 sps:$4 sm:$0xff]   ;;  %v2112_v16 = vld [vmem:[#allocation2 + $0x160] ss:$16 sps:$4 sm:$0xff]   ;;  %v2113_v17 = vld [vmem:[#allocation2 + $0x168] ss:$16 sps:$4 sm:$0xff]  }
  0x2c   :  { %v2114_v18 = vld [vmem:[#allocation2 + $0x184] ss:$16 sps:$4 sm:$0xff]   ;;  %v2116_v19 = vld [vmem:[#allocation2 + $0x18c] ss:$16 sps:$4 sm:$0xff]   ;;  %v2118_v20 = vld [vmem:[#allocation2 + $0x180] ss:$16 sps:$4 sm:$0xff]  }
  0x2d   :  { %v2119_v21 = vld [vmem:[#allocation2 + $0x188] ss:$16 sps:$4 sm:$0xff]   ;;  %v2120_v22 = vld [vmem:[#allocation2 + $0x1a4] ss:$16 sps:$4 sm:$0xff]   ;;  %v2122_v23 = vld [vmem:[#allocation2 + $0x1ac] ss:$16 sps:$4 sm:$0xff]  }
  0x2e   :  { %503 = vmatpush1.bf16.msra.mxu0 %v2100_v8  ;;  %544 = vmatpush1.bf16.msra.mxu1 %v2101_v9  ;;  %v2124_v24 = vld [vmem:[#allocation2 + $0x1a0] ss:$16 sps:$4 sm:$0xff]   ;;  %v2125_v25 = vld [vmem:[#allocation2 + $0x1a8] ss:$16 sps:$4 sm:$0xff]   ;;  %v2126_v26 = vld [vmem:[#allocation2 + $0x1c4] ss:$16 sps:$4 sm:$0xff]  }
  0x2f   :  { %504 = vmatprep.subr.bf16.mxu0 %v2102_v10  ;;  %545 = vmatprep.subr.bf16.mxu1 %v2104_v11  ;;  %v2128_v27 = vld [vmem:[#allocation2 + $0x1cc] ss:$16 sps:$4 sm:$0xff]   ;;  %v2130_v28 = vld [vmem:[#allocation2 + $0x1c0] ss:$16 sps:$4 sm:$0xff]   ;;  %v2131_v29 = vld [vmem:[#allocation2 + $0x1c8] ss:$16 sps:$4 sm:$0xff]  }
  0x30   :  { %v2132_v30 = vld [vmem:[#allocation2 + $0x1e4] ss:$16 sps:$4 sm:$0xff]   ;;  %v2134_v31 = vld [vmem:[#allocation2 + $0x1ec] ss:$16 sps:$4 sm:$0xff]   ;;  %v2136_v32 = vld [vmem:[#allocation2 + $0x1e0] ss:$16 sps:$4 sm:$0xff]  }
  0x31   :  { %v2137_v33 = vld [vmem:[#allocation2 + $0x1e8] ss:$16 sps:$4 sm:$0xff]   ;;  %v2140_v34 = vld [vmem:[#allocation2 + $0x4] ss:$16 sps:$4 sm:$0xff]   ;;  %v2143_v35 = vld [vmem:[#allocation2 + $0xc] ss:$16 sps:$4 sm:$0xff]  }
  0x32   :  { %505 = vmatpush1.bf16.msra.mxu0 %v2106_v12  ;;  %546 = vmatpush1.bf16.msra.mxu1 %v2107_v13  ;;  %v1856_v36 = vld [vmem:[%s2640_s1] ss:$0 sm:$0xff]  ;;  %v2475_v49 = vmov 683565275   ;;  %v2476_v51 = vmov 2475754826  }
  0x33   :  { %506 = vmatprep.subr.bf16.mxu0 %v2108_v14  ;;  %547 = vmatprep.subr.bf16.mxu1 %v2110_v15  ;;  %v2477_v54 = vmov 2131351028   ;;  %v2478_v57 = vmov 2102212464   ;;  %v2479_v60 = vmov 920167782  }
  0x34   :  { %v2480_v63 = vmov 1326507024   ;;  %s2481_s26 = smov [#allocation7]  }
  0x35   :  { %s1846_s27 = sshll.u32 %s2481_s26, 4  ;;  %s1847_s27 = int_to_ptr.vmem [resolvable:$true] %s1846_s27 }
  0x36   :  { %507 = vmatpush1.bf16.msra.mxu0 %v2112_v16  ;;  %548 = vmatpush1.bf16.msra.mxu1 %v2113_v17  ;;  %p2447_p3 = scmp.lt.s32.totalorder %s1847_s27, %s1847_s27 }
  0x37   :  { %508 = vmatprep.subr.bf16.mxu0 %v2114_v18  ;;  %549 = vmatprep.subr.bf16.mxu1 %v2116_v19 }
  0x3a   :  { %509 = vmatpush1.bf16.msra.mxu0 %v2118_v20  ;;  %550 = vmatpush1.bf16.msra.mxu1 %v2119_v21 }
  0x3b   :  { %510 = vmatprep.subr.bf16.mxu0 %v2120_v22  ;;  %551 = vmatprep.subr.bf16.mxu1 %v2122_v23 }
  0x3e   :  { %511 = vmatpush1.bf16.msra.mxu0 %v2124_v24  ;;  %552 = vmatpush1.bf16.msra.mxu1 %v2125_v25 }
  0x3f   :  { %512 = vmatprep.subr.bf16.mxu0 %v2126_v26  ;;  %553 = vmatprep.subr.bf16.mxu1 %v2128_v27 }
  0x42   :  { %513 = vmatpush1.bf16.msra.mxu0 %v2130_v28  ;;  %554 = vmatpush1.bf16.msra.mxu1 %v2131_v29 }
  0x43   :  { %514 = vmatprep.subr.bf16.mxu0 %v2132_v30  ;;  %555 = vmatprep.subr.bf16.mxu1 %v2134_v31 }
  0x46   :  { %515 = vmatpush1.bf16.msra.mxu0 %v2136_v32  ;;  %556 = vmatpush1.bf16.msra.mxu1 %v2137_v33 }
  0x47   :  { %742 = vmatprep.subr.bf16.mxu0 %v2140_v34  ;;  %783 = vmatprep.subr.bf16.mxu1 %v2143_v35 }
  0xa7   :  { %v58_v37 = vpop.permute.xlu0 %57 }
  0xa8   :  { %v2550_v38 = vmul.f32 %v1856_v36, %v58_v37 }
  0xaa   :  { %v70_v39 = vand.u32 2139095040, %v2550_v38  ;;  %v67_v43 = vand.u32 2147483647, %v2550_v38  ;;  %vm69_vm7 = vcmp.lt.s32.totalorder %v2550_v38, 0  ;;  %vm159_vm12 = vweird.f32 %v2550_v38 }
  0xac   :  { %v71_v40 = vshrl.u32 %v70_v39, 23  ;;  %v74_v46 = vand.u32 8388607, %v67_v43  ;;  %vm68_vm8 = vcmp.le.f32.partialorder %v67_v43, 0.7853982 }
  0xae   :  { %v1857_v41 = vadd.s32 4294967169, %v71_v40  ;;  %v75_v2 = vor.u32 8388608, %v74_v46 }
  0xb0   :  { %v77_v42 = vadd.s32 1, %v1857_v41  ;;  %v115_v16 = vshll.u32 %v75_v2, 8 }
  0xb2   :  { %vm78_vm0 = vcmp.gt.s32.totalorder %v77_v42, 0 }
  0xb3   :  { %v79_v44 = vsel %vm78_vm0, %v77_v42, 0 }
  0xb4   :  { %v81_v45 = vand.u32 31, %v79_v44  ;;  %v80_v48 = vshrl.u32 %v79_v44, 5 }
  0xb6   :  { %v82_v47 = vsub.s32 32, %v81_v45  ;;  %v84_v50 = vshll.u32 %v2475_v49, %v81_v45  ;;  %v87_v52 = vshll.u32 %v2476_v51, %v81_v45  ;;  %v90_v56 = vshll.u32 %v2477_v54, %v81_v45 }
  0xb7   :  { %v93_v59 = vshll.u32 %v2478_v57, %v81_v45  ;;  %v96_v62 = vshll.u32 %v2479_v60, %v81_v45  ;;  %vm99_vm1 = vcmp.lt.s32.totalorder %v80_v48, 1  ;;  %vm102_vm2 = vcmp.lt.s32.totalorder %v80_v48, 4 }
  0xb8   :  { %v85_v53 = vshrl.u32 %v2476_v51, %v82_v47  ;;  %v88_v55 = vshrl.u32 %v2477_v54, %v82_v47  ;;  %v91_v58 = vshrl.u32 %v2478_v57, %v82_v47  ;;  %v94_v61 = vshrl.u32 %v2479_v60, %v82_v47 }
  0xb9   :  { %v97_v1 = vshrl.u32 %v2480_v63, %v82_v47  ;;  %v83_v11 = vshrl.u32 %v2475_v49, %v82_v47  ;;  %vm101_vm3 = vcmp.lt.s32.totalorder %v80_v48, 3  ;;  %vm100_vm4 = vcmp.lt.s32.totalorder %v80_v48, 2 }
  0xba   :  { %v86_v3 = vor.u32 %v85_v53, %v84_v50  ;;  %v89_v4 = vor.u32 %v88_v55, %v87_v52  ;;  %v92_v5 = vor.u32 %v91_v58, %v90_v56  ;;  %v95_v6 = vor.u32 %v94_v61, %v93_v59 }
  0xbb   :  { %v98_v7 = vor.u32 %v97_v1, %v96_v62 }
  0xbc   :  { %v104_v8 = vsel %vm102_vm2, %v92_v5, 2102212464  ;;  %v107_v9 = vsel %vm99_vm1, %v86_v3, %v89_v4  ;;  %v111_v10 = vsel %vm99_vm1, %v89_v4, %v92_v5  ;;  %v108_v12 = vsel %vm102_vm2, %v95_v6, 920167782 }
  0xbd   :  { %v112_v13 = vsel %vm102_vm2, %v98_v7, 1326507024  ;;  %v109_v14 = vsel %vm101_vm3, %v92_v5, %v108_v12  ;;  %v103_v17 = vsel %vm99_vm1, %v83_v11, %v86_v3  ;;  %v105_v18 = vsel %vm101_vm3, %v89_v4, %v104_v8  ;;  %v2138_v3 = vld [vmem:[#allocation2] ss:$16 sps:$4 sm:$0xff]   ;;  %v2141_v4 = vld [vmem:[#allocation2 + $0x8] ss:$16 sps:$4 sm:$0xff]  }
  0xbe   :  { %v113_v15 = vsel %vm101_vm3, %v95_v6, %v112_v13  ;;  %v110_v19 = vsel %vm100_vm4, %v107_v9, %v109_v14  ;;  %v106_v25 = vsel %vm100_vm4, %v103_v17, %v105_v18  ;;  %v2146_v7 = vld [vmem:[#allocation2 + $0x24] ss:$16 sps:$4 sm:$0xff]   ;;  %v2149_v8 = vld [vmem:[#allocation2 + $0x2c] ss:$16 sps:$4 sm:$0xff]   ;;  %v2144_v9 = vld [vmem:[#allocation2 + $0x20] ss:$16 sps:$4 sm:$0xff]  }
  0xbf   :  { %v114_v20 = vsel %vm100_vm4, %v111_v10, %v113_v15  ;;  %v2559_v23 = vmul.u32.u64.low %v115_v16, %v110_v19  ;;  %v2560_v24 = vmul.u32.u64.high %v115_v16, %v110_v19, %v2559_v23  ;;  %v122_v27 = vmul.u32 %v115_v16, %v106_v25  ;;  %v2147_v10 = vld [vmem:[#allocation2 + $0x28] ss:$16 sps:$4 sm:$0xff]   ;;  %v2152_v11 = vld [vmem:[#allocation2 + $0x44] ss:$16 sps:$4 sm:$0xff]   ;;  %v2155_v12 = vld [vmem:[#allocation2 + $0x4c] ss:$16 sps:$4 sm:$0xff]  }
  0xc0   :  { %v2556_v21 = vmul.u32.u64.low %v115_v16, %v114_v20  ;;  %v2557_v22 = vmul.u32.u64.high %v115_v16, %v114_v20, %v2556_v21  ;;  %v2150_v13 = vld [vmem:[#allocation2 + $0x40] ss:$16 sps:$4 sm:$0xff]   ;;  %v2153_v14 = vld [vmem:[#allocation2 + $0x48] ss:$16 sps:$4 sm:$0xff]   ;;  %v2158_v15 = vld [vmem:[#allocation2 + $0x64] ss:$16 sps:$4 sm:$0xff]  }
  0xc1   :  { %v125_v26 = vadd.s32 1, %v2560_v24  ;;  %v2161_v16 = vld [vmem:[#allocation2 + $0x6c] ss:$16 sps:$4 sm:$0xff]   ;;  %v2156_v17 = vld [vmem:[#allocation2 + $0x60] ss:$16 sps:$4 sm:$0xff]  }
  0xc2   :  { %vm124_vm5 = vc.u32 %v2557_v22, %v2559_v23  ;;  %v123_v40 = vadd.s32 %v2559_v23, %v2557_v22  ;;  %v2159_v18 = vld [vmem:[#allocation2 + $0x68] ss:$16 sps:$4 sm:$0xff]   ;;  %v2164_v19 = vld [vmem:[#allocation2 + $0x84] ss:$16 sps:$4 sm:$0xff]   ;;  %v2167_v20 = vld [vmem:[#allocation2 + $0x8c] ss:$16 sps:$4 sm:$0xff]  }
  0xc3   :  { %v126_v28 = vsel %vm124_vm5, %v125_v26, %v2560_v24  ;;  %v2165_v22 = vld [vmem:[#allocation2 + $0x88] ss:$16 sps:$4 sm:$0xff]   ;;  %v2170_v23 = vld [vmem:[#allocation2 + $0xa4] ss:$16 sps:$4 sm:$0xff]   ;;  %v2173_v24 = vld [vmem:[#allocation2 + $0xac] ss:$16 sps:$4 sm:$0xff]  }
  0xc4   :  { %v127_v29 = vadd.s32 %v126_v28, %v122_v27  ;;  %v2168_v26 = vld [vmem:[#allocation2 + $0xa0] ss:$16 sps:$4 sm:$0xff]   ;;  %v2171_v27 = vld [vmem:[#allocation2 + $0xa8] ss:$16 sps:$4 sm:$0xff]   ;;  %v2176_v28 = vld [vmem:[#allocation2 + $0xc4] ss:$16 sps:$4 sm:$0xff]  }
  0xc6   :  { %v128_v30 = vadd.s32 536870912, %v127_v29 }
  0xc8   :  { %v129_v31 = vshrl.u32 %v128_v30, 30 }
  0xca   :  { %v130_v32 = vshll.u32 %v129_v31, 30  ;;  %v153_v55 = vsub.s32 4, %v129_v31 }
  0xcc   :  { %v131_v33 = vsub.s32 %v127_v29, %v130_v32  ;;  %v154_v57 = vsel %vm69_vm7, %v153_v55, %v129_v31  ;;  %v2179_v29 = vld [vmem:[#allocation2 + $0xcc] ss:$16 sps:$4 sm:$0xff]   ;;  %v2174_v32 = vld [vmem:[#allocation2 + $0xc0] ss:$16 sps:$4 sm:$0xff]  }
  0xcd   :  { %v156_v58 = vsel %vm68_vm8, 0, %v154_v57  ;;  %v2209_v55 = vld [vmem:[#allocation5 + $0x6c] ss:$16 sps:$4 sm:$0xff]   ;;  %v2207_v57 = vld [vmem:[#allocation5 + $0x68] ss:$16 sps:$4 sm:$0xff]  }
  0xce   :  { %v133_v34 = vsub.s32 0, %v131_v33  ;;  %v265_v59 = vand.u32 3, %v156_v58  ;;  %v160_v21 = vadd.s32 3, %v156_v58  ;;  %v2212_v58 = vld [vmem:[#allocation5 + $0x84] ss:$16 sps:$4 sm:$0xff]  }
  0xd0   :  { %v1858_v35 = vmin.u32 %v133_v34, %v131_v33  ;;  %vm270_vm9 = vcmp.eq.s32.totalorder %v265_v59, 2  ;;  %vm267_vm10 = vcmp.eq.s32.totalorder %v265_v59, 0  ;;  %vm266_vm11 = vcmp.lt.s32.totalorder %v265_v59, 2  ;;  %v2182_v34 = vld [vmem:[#allocation2 + $0xe4] ss:$16 sps:$4 sm:$0xff]  }
  0xd1   :  { %v161_v25 = vand.u32 3, %v160_v21  ;;  %v2215_v59 = vld [vmem:[#allocation5 + $0x8c] ss:$16 sps:$4 sm:$0xff]   ;;  %v2249_v21 = vld [vmem:[#allocation5 + $0x148] ss:$16 sps:$4 sm:$0xff]  }
  0xd2   :  { %v135_v36 = vclz %v1858_v35  ;;  %v2185_v35 = vld [vmem:[#allocation2 + $0xec] ss:$16 sps:$4 sm:$0xff]  }
  0xd3   :  { %vm163_vm13 = vcmp.eq.s32.totalorder %v161_v25, 0  ;;  %vm166_vm14 = vcmp.eq.s32.totalorder %v161_v25, 2  ;;  %vm162_vm15 = vcmp.lt.s32.totalorder %v161_v25, 2  ;;  %v2260_v25 = vld [vmem:[#allocation5 + $0x184] ss:$16 sps:$4 sm:$0xff]  }
  0xd4   :  { %v1859_v37 = vadd.s32 4294967294, %v135_v36 }
  0xd6   :  { %vm1860_vm6 = vcmp.lt.s32.totalorder %v1859_v37, 0 }
  0xd7   :  { %v138_v39 = vsel %vm1860_vm6, 0, %v1859_v37  ;;  %v2180_v37 = vld [vmem:[#allocation2 + $0xe0] ss:$16 sps:$4 sm:$0xff]  }
  0xd8   :  { %v139_v41 = vsub.s32 32, %v138_v39  ;;  %v143_v42 = vsub.s32 4294967266, %v138_v39  ;;  %v140_v44 = vshll.u32 %v131_v33, %v138_v39  ;;  %v2177_v33 = vld [vmem:[#allocation2 + $0xc8] ss:$16 sps:$4 sm:$0xff]  }
  0xd9   :  { %v2183_v39 = vld [vmem:[#allocation2 + $0xe8] ss:$16 sps:$4 sm:$0xff]  }
  0xda   :  { %v141_v45 = vshrl.u32 %v123_v40, %v139_v41  ;;  %v144_v46 = vadd.s32 127, %v143_v42  ;;  %v2188_v42 = vld [vmem:[#allocation5 + $0x4] ss:$16 sps:$4 sm:$0xff]  }
  0xdc   :  { %v142_v47 = vor.u32 %v141_v45, %v140_v44  ;;  %v145_v48 = vshll.u32 %v144_v46, 23  ;;  %v2191_v44 = vld [vmem:[#allocation5 + $0xc] ss:$16 sps:$4 sm:$0xff]   ;;  %v2186_v45 = vld [vmem:[#allocation5] ss:$16 sps:$4 sm:$0xff]  }
  0xdd   :  { %v2189_v46 = vld [vmem:[#allocation5 + $0x8] ss:$16 sps:$4 sm:$0xff]  }
  0xde   :  { %v146_v49 = vor.u32 4788187, %v145_v48  ;;  %v149_v51 = vcvt.s32.f32 %v142_v47  ;;  %v2194_v47 = vld [vmem:[#allocation5 + $0x24] ss:$16 sps:$4 sm:$0xff]   ;;  %v2197_v48 = vld [vmem:[#allocation5 + $0x2c] ss:$16 sps:$4 sm:$0xff]  }
  0xe0   :  { %v147_v50 = vand.u32 2147483647, %v146_v49  ;;  %v2192_v49 = vld [vmem:[#allocation5 + $0x20] ss:$16 sps:$4 sm:$0xff]  }
  0xe2   :  { %v150_v52 = vmul.f32 %v149_v51, %v147_v50  ;;  %v2195_v50 = vld [vmem:[#allocation5 + $0x28] ss:$16 sps:$4 sm:$0xff]   ;;  %v2203_v51 = vld [vmem:[#allocation5 + $0x4c] ss:$16 sps:$4 sm:$0xff]  }
  0xe4   :  { %v151_v53 = vxor.u32 2147483648, %v150_v52 }
  0xe6   :  { %v152_v54 = vsel %vm69_vm7, %v151_v53, %v150_v52  ;;  %v2198_v52 = vld [vmem:[#allocation5 + $0x40] ss:$16 sps:$4 sm:$0xff]   ;;  %v2201_v53 = vld [vmem:[#allocation5 + $0x48] ss:$16 sps:$4 sm:$0xff]  }
  0xe7   :  { %v155_v56 = vsel %vm68_vm8, %v2550_v38, %v152_v54  ;;  %v2200_v38 = vld [vmem:[#allocation5 + $0x44] ss:$16 sps:$4 sm:$0xff]  }
  0xe8   :  { %2378 = vcosq.f32 %v155_v56  ;;  %v2206_v54 = vld [vmem:[#allocation5 + $0x64] ss:$16 sps:$4 sm:$0xff]  }
  0xe9   :  { %2380 = vsinq.f32 %v155_v56  ;;  %v2204_v56 = vld [vmem:[#allocation5 + $0x60] ss:$16 sps:$4 sm:$0xff]  }
  0xf2   :  { %v2570_v60 = vpop.eup %2378 }
  0xf3   :  { %v2572_v61 = vpop.eup %2380  ;;  %v167_v62 = vxor.u32 2147483648, %v2570_v60 }
  0xf4   :  { %v164_v63 = vxor.u32 2147483648, %v2572_v61 }
  0xf5   :  { %v272_v43 = vsel %vm270_vm9, %v167_v62, %v2572_v61  ;;  %v168_v31 = vsel %vm166_vm14, %v167_v62, %v2572_v61  ;;  %v2213_v61 = vld [vmem:[#allocation5 + $0x88] ss:$16 sps:$4 sm:$0xff]   ;;  %v2218_v62 = vld [vmem:[#allocation5 + $0xa4] ss:$16 sps:$4 sm:$0xff]  }
  0xf6   :  { %v269_v1 = vsel %vm267_vm10, %v2570_v60, %v164_v63  ;;  %v165_v30 = vsel %vm163_vm13, %v2570_v60, %v164_v63  ;;  %v2210_v60 = vld [vmem:[#allocation5 + $0x80] ss:$16 sps:$4 sm:$0xff]   ;;  %v2221_v63 = vld [vmem:[#allocation5 + $0xac] ss:$16 sps:$4 sm:$0xff]  }
  0xf7   :  { %v273_v2 = vsel %vm266_vm11, %v269_v1, %v272_v43  ;;  %v169_v36 = vsel %vm162_vm15, %v165_v30, %v168_v31  ;;  %v2216_v43 = vld [vmem:[#allocation5 + $0xa0] ss:$16 sps:$4 sm:$0xff]   ;;  %v2219_v1 = vld [vmem:[#allocation5 + $0xa8] ss:$16 sps:$4 sm:$0xff]   ;;  %v2269_v30 = vld [vmem:[#allocation5 + $0x1ac] ss:$16 sps:$4 sm:$0xff]  }
  0xf8   :  { %v274_v5 = vsel %vm159_vm12, nan, %v273_v2  ;;  %v170_v40 = vsel %vm159_vm12, nan, %v169_v36  ;;  %v2224_v2 = vld [vmem:[#allocation5 + $0xc4] ss:$16 sps:$4 sm:$0xff]   ;;  %v2264_v31 = vld [vmem:[#allocation5 + $0x1a0] ss:$16 sps:$4 sm:$0xff]  }
  0xf9   :  { %v275_v6 = vpack.c.bf16 %v274_v5, %v274_v5  ;;  %v171_v41 = vpack.c.bf16 %v170_v40, %v170_v40  ;;  %v2225_v5 = vld [vmem:[#allocation5 + $0xc8] ss:$16 sps:$4 sm:$0xff]   ;;  %v2276_v40 = vld [vmem:[#allocation5 + $0x1e0] ss:$16 sps:$4 sm:$0xff]  }
  0xfa   :  { %v2273_v36 = vld [vmem:[#allocation5 + $0x1c8] ss:$16 sps:$4 sm:$0xff]  }
  0xfb   :  { %533 = vmatmul.mubr.bf16.vlgmr.msra.gmra.mrb[0].mxu0 %v275_v6  ;;  %574 = vmatmul.mubr.bf16.vlgmr.msra.gmra.mrb[0].mxu1 %v275_v6  ;;  %v2230_v6 = vld [vmem:[#allocation5 + $0xe4] ss:$16 sps:$4 sm:$0xff]  }
  0xfc   :  { %743 = vmatpush1.bf16.msra.mxu0 %v2138_v3  ;;  %784 = vmatpush1.bf16.msra.mxu1 %v2141_v4  ;;  %v2227_v3 = vld [vmem:[#allocation5 + $0xcc] ss:$16 sps:$4 sm:$0xff]   ;;  %v2222_v4 = vld [vmem:[#allocation5 + $0xc0] ss:$16 sps:$4 sm:$0xff]  }
  0xfd   :  { %744 = vmatprep.subr.bf16.mxu0 %v2146_v7  ;;  %785 = vmatprep.subr.bf16.mxu1 %v2149_v8  ;;  %v2233_v7 = vld [vmem:[#allocation5 + $0xec] ss:$16 sps:$4 sm:$0xff]   ;;  %v2228_v8 = vld [vmem:[#allocation5 + $0xe0] ss:$16 sps:$4 sm:$0xff]  }
  0xfe   :  { %774 = vmatprep.mubr.bf16.mxu0 %v2474_v0  ;;  %815 = vmatprep.mubr.bf16.mxu1 %v2474_v0  ;;  %v2162_v0 = vld [vmem:[#allocation2 + $0x80] ss:$16 sps:$4 sm:$0xff]  }
 0x100   :  { %745 = vmatpush1.bf16.msra.mxu0 %v2144_v9  ;;  %786 = vmatpush1.bf16.msra.mxu1 %v2147_v10  ;;  %v2231_v9 = vld [vmem:[#allocation5 + $0xe8] ss:$16 sps:$4 sm:$0xff]   ;;  %v2236_v10 = vld [vmem:[#allocation5 + $0x104] ss:$16 sps:$4 sm:$0xff]  }
 0x101   :  { %746 = vmatprep.subr.bf16.mxu0 %v2152_v11  ;;  %787 = vmatprep.subr.bf16.mxu1 %v2155_v12  ;;  %v2239_v11 = vld [vmem:[#allocation5 + $0x10c] ss:$16 sps:$4 sm:$0xff]   ;;  %v2234_v12 = vld [vmem:[#allocation5 + $0x100] ss:$16 sps:$4 sm:$0xff]  }
 0x104   :  { %747 = vmatpush1.bf16.msra.mxu0 %v2150_v13  ;;  %788 = vmatpush1.bf16.msra.mxu1 %v2153_v14  ;;  %v2237_v13 = vld [vmem:[#allocation5 + $0x108] ss:$16 sps:$4 sm:$0xff]   ;;  %v2242_v14 = vld [vmem:[#allocation5 + $0x124] ss:$16 sps:$4 sm:$0xff]  }
 0x105   :  { %748 = vmatprep.subr.bf16.mxu0 %v2158_v15  ;;  %789 = vmatprep.subr.bf16.mxu1 %v2161_v16  ;;  %v2245_v15 = vld [vmem:[#allocation5 + $0x12c] ss:$16 sps:$4 sm:$0xff]   ;;  %v2240_v16 = vld [vmem:[#allocation5 + $0x120] ss:$16 sps:$4 sm:$0xff]  }
 0x108   :  { %749 = vmatpush1.bf16.msra.mxu0 %v2156_v17  ;;  %790 = vmatpush1.bf16.msra.mxu1 %v2159_v18  ;;  %v2243_v17 = vld [vmem:[#allocation5 + $0x128] ss:$16 sps:$4 sm:$0xff]   ;;  %v2248_v18 = vld [vmem:[#allocation5 + $0x144] ss:$16 sps:$4 sm:$0xff]  }
 0x109   :  { %750 = vmatprep.subr.bf16.mxu0 %v2164_v19  ;;  %791 = vmatprep.subr.bf16.mxu1 %v2167_v20  ;;  %v2251_v19 = vld [vmem:[#allocation5 + $0x14c] ss:$16 sps:$4 sm:$0xff]   ;;  %v2246_v20 = vld [vmem:[#allocation5 + $0x140] ss:$16 sps:$4 sm:$0xff]  }
 0x10c   :  { %751 = vmatpush1.bf16.msra.mxu0 %v2162_v0  ;;  %792 = vmatpush1.bf16.msra.mxu1 %v2165_v22  ;;  %v2254_v0 = vld [vmem:[#allocation5 + $0x164] ss:$16 sps:$4 sm:$0xff]   ;;  %v2257_v22 = vld [vmem:[#allocation5 + $0x16c] ss:$16 sps:$4 sm:$0xff]  }
 0x10d   :  { %752 = vmatprep.subr.bf16.mxu0 %v2170_v23  ;;  %793 = vmatprep.subr.bf16.mxu1 %v2173_v24  ;;  %v2252_v23 = vld [vmem:[#allocation5 + $0x160] ss:$16 sps:$4 sm:$0xff]   ;;  %v2255_v24 = vld [vmem:[#allocation5 + $0x168] ss:$16 sps:$4 sm:$0xff]  }
 0x110   :  { %753 = vmatpush1.bf16.msra.mxu0 %v2168_v26  ;;  %794 = vmatpush1.bf16.msra.mxu1 %v2171_v27  ;;  %v2263_v26 = vld [vmem:[#allocation5 + $0x18c] ss:$16 sps:$4 sm:$0xff]   ;;  %v2258_v27 = vld [vmem:[#allocation5 + $0x180] ss:$16 sps:$4 sm:$0xff]  }
 0x111   :  { %754 = vmatprep.subr.bf16.mxu0 %v2176_v28  ;;  %795 = vmatprep.subr.bf16.mxu1 %v2179_v29  ;;  %v2261_v28 = vld [vmem:[#allocation5 + $0x188] ss:$16 sps:$4 sm:$0xff]   ;;  %v2266_v29 = vld [vmem:[#allocation5 + $0x1a4] ss:$16 sps:$4 sm:$0xff]  }
 0x114   :  { %755 = vmatpush1.bf16.msra.mxu0 %v2174_v32  ;;  %796 = vmatpush1.bf16.msra.mxu1 %v2177_v33  ;;  %v2267_v32 = vld [vmem:[#allocation5 + $0x1a8] ss:$16 sps:$4 sm:$0xff]   ;;  %v2272_v33 = vld [vmem:[#allocation5 + $0x1c4] ss:$16 sps:$4 sm:$0xff]  }
 0x115   :  { %756 = vmatprep.subr.bf16.mxu0 %v2182_v34  ;;  %797 = vmatprep.subr.bf16.mxu1 %v2185_v35  ;;  %v2275_v34 = vld [vmem:[#allocation5 + $0x1cc] ss:$16 sps:$4 sm:$0xff]   ;;  %v2270_v35 = vld [vmem:[#allocation5 + $0x1c0] ss:$16 sps:$4 sm:$0xff]  }
 0x118   :  { %757 = vmatpush1.bf16.msra.mxu0 %v2180_v37  ;;  %798 = vmatpush1.bf16.msra.mxu1 %v2183_v39  ;;  %v2278_v37 = vld [vmem:[#allocation5 + $0x1e4] ss:$16 sps:$4 sm:$0xff]   ;;  %v2281_v39 = vld [vmem:[#allocation5 + $0x1ec] ss:$16 sps:$4 sm:$0xff]  }
 0x119   :  { %1672 = vmatprep.subr.bf16.mxu0 %v2188_v42  ;;  %1754 = vmatprep.subr.bf16.mxu1 %v2191_v44  ;;  %v2284_v42 = vld [vmem:[#allocation5 + $0x204] ss:$16 sps:$4 sm:$0xff]   ;;  %v2287_v44 = vld [vmem:[#allocation5 + $0x20c] ss:$16 sps:$4 sm:$0xff]  }
 0x11b   :  { %775 = vmatmul.mubr.bf16.vlgmr.msra.gmra.mrb[4].mxu0 %v171_v41  ;;  %816 = vmatmul.mubr.bf16.vlgmr.msra.gmra.mrb[4].mxu1 %v171_v41  ;;  %v2279_v41 = vld [vmem:[#allocation5 + $0x1e8] ss:$16 sps:$4 sm:$0xff]  }
 0x11c   :  { %1673 = vmatpush1.bf16.msra.mxu0 %v2186_v45  ;;  %1755 = vmatpush1.bf16.msra.mxu1 %v2189_v46 }
 0x11d   :  { %1674 = vmatprep.subr.bf16.mxu0 %v2194_v47  ;;  %1756 = vmatprep.subr.bf16.mxu1 %v2197_v48 }
 0x120   :  { %1675 = vmatpush1.bf16.msra.mxu0 %v2192_v49  ;;  %1757 = vmatpush1.bf16.msra.mxu1 %v2195_v50 }
 0x121   :  { %1676 = vmatprep.subr.bf16.mxu0 %v2200_v38  ;;  %1758 = vmatprep.subr.bf16.mxu1 %v2203_v51 }
 0x124   :  { %1677 = vmatpush1.bf16.msra.mxu0 %v2198_v52  ;;  %1759 = vmatpush1.bf16.msra.mxu1 %v2201_v53  ;;  %v826_v52 = vlaneseq }
 0x125   :  { %1678 = vmatprep.subr.bf16.mxu0 %v2206_v54  ;;  %1760 = vmatprep.subr.bf16.mxu1 %v2209_v55 }
 0x126   :  { %v2595_v53 = vshrl.u32 %v826_v52, 7  ;;  %v2317_v52 = vld [vmem:[#allocation5 + $0x2ac] ss:$16 sps:$4 sm:$0xff]  }
 0x128   :  { %1679 = vmatpush1.bf16.msra.mxu0 %v2204_v56  ;;  %1761 = vmatpush1.bf16.msra.mxu1 %v2207_v57  ;;  %v828_v54 = vsub.s32 0, %v2595_v53  ;;  %v836_v55 = vsub.s32 2, %v2595_v53  ;;  %v824_v56 = vld [vmem:[%s2642_s3] sm:$0xf]  ;;  %v832_v57 = vsub.s32 1, %v2595_v53 }
 0x129   :  { %1680 = vmatprep.subr.bf16.mxu0 %v2212_v58  ;;  %1762 = vmatprep.subr.bf16.mxu1 %v2215_v59  ;;  %v840_v58 = vsub.s32 3, %v2595_v53 }
 0x12a   :  { %v829_v59 = vrot.slane %v824_v56, %v828_v54 }
 0x12c   :  { %1681 = vmatpush1.bf16.msra.mxu0 %v2210_v60  ;;  %1763 = vmatpush1.bf16.msra.mxu1 %v2213_v61  ;;  %v837_v60 = vrot.slane %v824_v56, %v836_v55 }
 0x12d   :  { %1682 = vmatprep.subr.bf16.mxu0 %v2218_v62  ;;  %1764 = vmatprep.subr.bf16.mxu1 %v2221_v63  ;;  %v833_v63 = vrot.slane %v824_v56, %v832_v57 }
 0x130   :  { %1683 = vmatpush1.bf16.msra.mxu0 %v2216_v43  ;;  %1765 = vmatpush1.bf16.msra.mxu1 %v2219_v1  ;;  %v841_v43 = vrot.slane %v824_v56, %v840_v58  ;;  %v2312_v56 = vld [vmem:[#allocation5 + $0x2a0] ss:$16 sps:$4 sm:$0xff]  }
 0x131   :  { %1684 = vmatprep.subr.bf16.mxu0 %v2224_v2  ;;  %1766 = vmatprep.subr.bf16.mxu1 %v2227_v3 }
 0x134   :  { %1685 = vmatpush1.bf16.msra.mxu0 %v2222_v4  ;;  %1767 = vmatpush1.bf16.msra.mxu1 %v2225_v5 }
 0x135   :  { %1686 = vmatprep.subr.bf16.mxu0 %v2230_v6  ;;  %1768 = vmatprep.subr.bf16.mxu1 %v2233_v7 }
 0x138   :  { %1687 = vmatpush1.bf16.msra.mxu0 %v2228_v8  ;;  %1769 = vmatpush1.bf16.msra.mxu1 %v2231_v9 }
 0x139   :  { %1688 = vmatprep.subr.bf16.mxu0 %v2236_v10  ;;  %1770 = vmatprep.subr.bf16.mxu1 %v2239_v11 }
 0x13c   :  { %1689 = vmatpush1.bf16.msra.mxu0 %v2234_v12  ;;  %1771 = vmatpush1.bf16.msra.mxu1 %v2237_v13 }
 0x13d   :  { %1690 = vmatprep.subr.bf16.mxu0 %v2242_v14  ;;  %1772 = vmatprep.subr.bf16.mxu1 %v2245_v15 }
 0x140   :  { %1691 = vmatpush1.bf16.msra.mxu0 %v2240_v16  ;;  %1773 = vmatpush1.bf16.msra.mxu1 %v2243_v17 }
 0x141   :  { %1692 = vmatprep.subr.bf16.mxu0 %v2248_v18  ;;  %1774 = vmatprep.subr.bf16.mxu1 %v2251_v19 }
 0x144   :  { %1693 = vmatpush1.bf16.msra.mxu0 %v2246_v20  ;;  %1775 = vmatpush1.bf16.msra.mxu1 %v2249_v21 }
 0x145   :  { %1694 = vmatprep.subr.bf16.mxu0 %v2254_v0  ;;  %1776 = vmatprep.subr.bf16.mxu1 %v2257_v22 }
 0x148   :  { %1695 = vmatpush1.bf16.msra.mxu0 %v2252_v23  ;;  %1777 = vmatpush1.bf16.msra.mxu1 %v2255_v24 }
 0x149   :  { %1696 = vmatprep.subr.bf16.mxu0 %v2260_v25  ;;  %1778 = vmatprep.subr.bf16.mxu1 %v2263_v26 }
 0x14c   :  { %1697 = vmatpush1.bf16.msra.mxu0 %v2258_v27  ;;  %1779 = vmatpush1.bf16.msra.mxu1 %v2261_v28 }
 0x14d   :  { %1698 = vmatprep.subr.bf16.mxu0 %v2266_v29  ;;  %1780 = vmatprep.subr.bf16.mxu1 %v2269_v30  ;;  %v2282_v30 = vld [vmem:[#allocation5 + $0x200] ss:$16 sps:$4 sm:$0xff]  }
 0x150   :  { %1699 = vmatpush1.bf16.msra.mxu0 %v2264_v31  ;;  %1781 = vmatpush1.bf16.msra.mxu1 %v2267_v32  ;;  %v2285_v31 = vld [vmem:[#allocation5 + $0x208] ss:$16 sps:$4 sm:$0xff]  }
 0x151   :  { %1700 = vmatprep.subr.bf16.mxu0 %v2272_v33  ;;  %1782 = vmatprep.subr.bf16.mxu1 %v2275_v34  ;;  %v2290_v33 = vld [vmem:[#allocation5 + $0x224] ss:$16 sps:$4 sm:$0xff]   ;;  %v2293_v34 = vld [vmem:[#allocation5 + $0x22c] ss:$16 sps:$4 sm:$0xff]  }
 0x154   :  { %1701 = vmatpush1.bf16.msra.mxu0 %v2270_v35  ;;  %1783 = vmatpush1.bf16.msra.mxu1 %v2273_v36  ;;  %v2288_v36 = vld [vmem:[#allocation5 + $0x220] ss:$16 sps:$4 sm:$0xff]  }
 0x155   :  { %1702 = vmatprep.subr.bf16.mxu0 %v2278_v37  ;;  %1784 = vmatprep.subr.bf16.mxu1 %v2281_v39  ;;  %v2291_v37 = vld [vmem:[#allocation5 + $0x228] ss:$16 sps:$4 sm:$0xff]   ;;  %v2296_v39 = vld [vmem:[#allocation5 + $0x244] ss:$16 sps:$4 sm:$0xff]  }
 0x158   :  { %1703 = vmatpush1.bf16.msra.mxu0 %v2276_v40  ;;  %1785 = vmatpush1.bf16.msra.mxu1 %v2279_v41  ;;  %v2299_v40 = vld [vmem:[#allocation5 + $0x24c] ss:$16 sps:$4 sm:$0xff]   ;;  %v2294_v41 = vld [vmem:[#allocation5 + $0x240] ss:$16 sps:$4 sm:$0xff]  }
 0x159   :  { %1713 = vmatprep.subr.bf16.mxu0 %v2284_v42  ;;  %1795 = vmatprep.subr.bf16.mxu1 %v2287_v44  ;;  %v2297_v42 = vld [vmem:[#allocation5 + $0x248] ss:$16 sps:$4 sm:$0xff]   ;;  %v2302_v44 = vld [vmem:[#allocation5 + $0x264] ss:$16 sps:$4 sm:$0xff]  }
 0x1ce   :  { %v534_v45 = vpop.f32.mrb[0].mxu0  ;;  %v575_v46 = vpop.f32.mrb[0].mxu1 }
 0x1cf   :  { %v536_v47 = vpop.f32.mrb[1].mxu0  ;;  %v577_v48 = vpop.f32.mrb[1].mxu1 }
 0x1d0   :  { %v538_v49 = vpop.f32.mrb[2].mxu0  ;;  %v579_v50 = vpop.f32.mrb[2].mxu1 }
 0x1d1   :  { %v539_v38 = vpop.f32.mrb[3].mxu0  ;;  %v580_v51 = vpop.f32.mrb[3].mxu1  ;;  %v2311_v49 = vld [vmem:[#allocation5 + $0x28c] ss:$16 sps:$4 sm:$0xff]   ;;  %v2306_v50 = vld [vmem:[#allocation5 + $0x280] ss:$16 sps:$4 sm:$0xff]  }
 0x1d2   :  { %v2309_v38 = vld [vmem:[#allocation5 + $0x288] ss:$16 sps:$4 sm:$0xff]   ;;  %v2314_v51 = vld [vmem:[#allocation5 + $0x2a4] ss:$16 sps:$4 sm:$0xff]  }
 0x1ee   :  { %v776_v61 = vpop.f32.mrb[4].mxu0  ;;  %v817_v62 = vpop.f32.mrb[4].mxu1 }
 0x1ef   :  { %v777_v1 = vadd.f32 %v776_v61, %v534_v45  ;;  %v818_v2 = vadd.f32 %v817_v62, %v575_v46  ;;  %v778_v3 = vpop.f32.mrb[5].mxu0  ;;  %v819_v4 = vpop.f32.mrb[5].mxu1  ;;  %v2305_v45 = vld [vmem:[#allocation5 + $0x26c] ss:$16 sps:$4 sm:$0xff]   ;;  %v2300_v46 = vld [vmem:[#allocation5 + $0x260] ss:$16 sps:$4 sm:$0xff]  }
 0x1f0   :  { %v779_v5 = vadd.f32 %v778_v3, %v536_v47  ;;  %v820_v6 = vadd.f32 %v819_v4, %v577_v48  ;;  %v780_v7 = vpop.f32.mrb[6].mxu0  ;;  %v821_v8 = vpop.f32.mrb[6].mxu1  ;;  %v2303_v47 = vld [vmem:[#allocation5 + $0x268] ss:$16 sps:$4 sm:$0xff]   ;;  %v2308_v48 = vld [vmem:[#allocation5 + $0x284] ss:$16 sps:$4 sm:$0xff]  }
 0x1f1   :  { %v846_v9 = vadd.f32 %v829_v59, %v777_v1  ;;  %v2612_v10 = vadd.f32 %v837_v60, %v818_v2  ;;  %v781_v11 = vpop.f32.mrb[7].mxu0  ;;  %v822_v12 = vpop.f32.mrb[7].mxu1  ;;  %v2315_v59 = vld [vmem:[#allocation5 + $0x2a8] ss:$16 sps:$4 sm:$0xff]   ;;  %v2320_v60 = vld [vmem:[#allocation5 + $0x2c4] ss:$16 sps:$4 sm:$0xff]  }
 0x1f2   :  { %v847_v13 = vadd.f32 %v833_v63, %v779_v5  ;;  %v849_v14 = vadd.f32 %v841_v43, %v820_v6  ;;  %v2323_v61 = vld [vmem:[#allocation5 + $0x2cc] ss:$16 sps:$4 sm:$0xff]   ;;  %v2318_v62 = vld [vmem:[#allocation5 + $0x2c0] ss:$16 sps:$4 sm:$0xff]   ;;  %v2321_v63 = vld [vmem:[#allocation5 + $0x2c8] ss:$16 sps:$4 sm:$0xff]  }
 0x1f3   :  { %v1929_v15 = vmul.f32 -1.442695, %v846_v9  ;;  %v2326_v43 = vld [vmem:[#allocation5 + $0x2e4] ss:$16 sps:$4 sm:$0xff]   ;;  %v2329_v1 = vld [vmem:[#allocation5 + $0x2ec] ss:$16 sps:$4 sm:$0xff]  }
 0x1f4   :  { %v1930_v16 = vmul.f32 -1.442695, %v847_v13  ;;  %v1932_v17 = vmul.f32 -1.442695, %v849_v14  ;;  %v1931_v2 = vmul.f32 -1.442695, %v2612_v10 }
 0x1f5   :  { %2382 = vpow2.f32 %v1929_v15  ;;  %v2324_v3 = vld [vmem:[#allocation5 + $0x2e0] ss:$16 sps:$4 sm:$0xff]   ;;  %v2327_v4 = vld [vmem:[#allocation5 + $0x2e8] ss:$16 sps:$4 sm:$0xff]   ;;  %v2332_v5 = vld [vmem:[#allocation5 + $0x304] ss:$16 sps:$4 sm:$0xff]  }
 0x1f6   :  { %2384 = vpow2.f32 %v1930_v16  ;;  %v2335_v6 = vld [vmem:[#allocation5 + $0x30c] ss:$16 sps:$4 sm:$0xff]   ;;  %v2330_v7 = vld [vmem:[#allocation5 + $0x300] ss:$16 sps:$4 sm:$0xff]   ;;  %v2333_v8 = vld [vmem:[#allocation5 + $0x308] ss:$16 sps:$4 sm:$0xff]  }
 0x1f7   :  { %2386 = vpow2.f32 %v1932_v17  ;;  %v2341_v11 = vld [vmem:[#allocation5 + $0x32c] ss:$16 sps:$4 sm:$0xff]   ;;  %v2336_v12 = vld [vmem:[#allocation5 + $0x320] ss:$16 sps:$4 sm:$0xff]   ;;  %v2345_v17 = vld [vmem:[#allocation5 + $0x348] ss:$16 sps:$4 sm:$0xff]  }
 0x1f8   :  { %v2347_v15 = vld [vmem:[#allocation5 + $0x34c] ss:$16 sps:$4 sm:$0xff]   ;;  %v2342_v16 = vld [vmem:[#allocation5 + $0x340] ss:$16 sps:$4 sm:$0xff]  }
 0x1ff   :  { %v2383_v18 = vpop.eup %2382 }
 0x200   :  { %v862_v19 = vadd.f32 1.0, %v2383_v18  ;;  %v2385_v20 = vpop.eup %2384 }
 0x201   :  { %v2387_v21 = vpop.eup %2386  ;;  %v863_v0 = vadd.f32 1.0, %v2385_v20  ;;  %v2353_v20 = vld [vmem:[#allocation5 + $0x36c] ss:$16 sps:$4 sm:$0xff]  }
 0x202   :  { %2388 = vrcp.f32 %v862_v19  ;;  %v865_v22 = vadd.f32 1.0, %v2387_v21  ;;  %v2350_v19 = vld [vmem:[#allocation5 + $0x364] ss:$16 sps:$4 sm:$0xff]  }
 0x203   :  { %2390 = vrcp.f32 %v863_v0  ;;  %v2348_v0 = vld [vmem:[#allocation5 + $0x360] ss:$16 sps:$4 sm:$0xff]  }
 0x204   :  { %2392 = vrcp.f32 %v865_v22  ;;  %v2351_v22 = vld [vmem:[#allocation5 + $0x368] ss:$16 sps:$4 sm:$0xff]  }
 0x205   :  { %2394 = vpow2.f32 %v1931_v2 }
 0x20c   :  { %v2389_v23 = vpop.eup %2388 }
 0x20d   :  { %v2391_v24 = vpop.eup %2390  ;;  %v874_v25 = vmul.f32 %v2389_v23, %v846_v9  ;;  %v2338_v9 = vld [vmem:[#allocation5 + $0x324] ss:$16 sps:$4 sm:$0xff]  }
 0x20e   :  { %v2393_v26 = vpop.eup %2392  ;;  %v875_v27 = vmul.f32 %v2391_v24, %v847_v13  ;;  %v2339_v13 = vld [vmem:[#allocation5 + $0x328] ss:$16 sps:$4 sm:$0xff]   ;;  %v2356_v23 = vld [vmem:[#allocation5 + $0x384] ss:$16 sps:$4 sm:$0xff]   ;;  %v2359_v24 = vld [vmem:[#allocation5 + $0x38c] ss:$16 sps:$4 sm:$0xff]  }
 0x20f   :  { %v877_v28 = vmul.f32 %v2393_v26, %v849_v14  ;;  %v878_v32 = vpack.c.bf16 %v874_v25, %v874_v25  ;;  %v2344_v14 = vld [vmem:[#allocation5 + $0x344] ss:$16 sps:$4 sm:$0xff]   ;;  %v2395_v18 = vpop.eup %2394  ;;  %v2354_v25 = vld [vmem:[#allocation5 + $0x380] ss:$16 sps:$4 sm:$0xff]   ;;  %v2357_v26 = vld [vmem:[#allocation5 + $0x388] ss:$16 sps:$4 sm:$0xff]  }
 0x210   :  { %v879_v29 = vpack.c.bf16 %v875_v27, %v875_v27  ;;  %v864_v21 = vadd.f32 1.0, %v2395_v18  ;;  %v2362_v27 = vld [vmem:[#allocation5 + $0x3a4] ss:$16 sps:$4 sm:$0xff]  }
 0x211   :  { %v881_v35 = vpack.c.bf16 %v877_v28, %v877_v28  ;;  %v2365_v28 = vld [vmem:[#allocation5 + $0x3ac] ss:$16 sps:$4 sm:$0xff]  }
 0x212   :  { %1704 = vmatprep.mubr.bf16.mxu0 %v879_v29  ;;  %1786 = vmatprep.mubr.bf16.mxu1 %v879_v29  ;;  %2396 = vrcp.f32 %v864_v21  ;;  %v2360_v29 = vld [vmem:[#allocation5 + $0x3a0] ss:$16 sps:$4 sm:$0xff]  }
 0x213   :  { %1705 = vmatmul.mubr.bf16.vlgmr.msra.gmra.mrb[8].mxu0 %v878_v32  ;;  %1787 = vmatmul.mubr.bf16.vlgmr.msra.gmra.mrb[8].mxu1 %v878_v32  ;;  %v2371_v32 = vld [vmem:[#allocation5 + $0x3cc] ss:$16 sps:$4 sm:$0xff]  }
 0x214   :  { %1714 = vmatpush1.bf16.msra.mxu0 %v2282_v30  ;;  %1796 = vmatpush1.bf16.msra.mxu1 %v2285_v31  ;;  %v2363_v30 = vld [vmem:[#allocation5 + $0x3a8] ss:$16 sps:$4 sm:$0xff]   ;;  %v2368_v31 = vld [vmem:[#allocation5 + $0x3c4] ss:$16 sps:$4 sm:$0xff]  }
 0x215   :  { %1745 = vmatprep.mubr.bf16.mxu0 %v881_v35  ;;  %1827 = vmatprep.mubr.bf16.mxu1 %v881_v35  ;;  %v2374_v35 = vld [vmem:[#allocation5 + $0x3e4] ss:$16 sps:$4 sm:$0xff]  }
 0x216   :  { %1715 = vmatprep.subr.bf16.mxu0 %v2290_v33  ;;  %1797 = vmatprep.subr.bf16.mxu1 %v2293_v34  ;;  %v2366_v33 = vld [vmem:[#allocation5 + $0x3c0] ss:$16 sps:$4 sm:$0xff]   ;;  %v2369_v34 = vld [vmem:[#allocation5 + $0x3c8] ss:$16 sps:$4 sm:$0xff]  }
 0x218   :  { %1716 = vmatpush1.bf16.msra.mxu0 %v2288_v36  ;;  %1798 = vmatpush1.bf16.msra.mxu1 %v2291_v37  ;;  %v2377_v36 = vld [vmem:[#allocation5 + $0x3ec] ss:$16 sps:$4 sm:$0xff]  }
 0x219   :  { %1717 = vmatprep.subr.bf16.mxu0 %v2296_v39  ;;  %1799 = vmatprep.subr.bf16.mxu1 %v2299_v40  ;;  %v2372_v39 = vld [vmem:[#allocation5 + $0x3e0] ss:$16 sps:$4 sm:$0xff]   ;;  %v2375_v40 = vld [vmem:[#allocation5 + $0x3e8] ss:$16 sps:$4 sm:$0xff]  }
 0x21c   :  { %1718 = vmatpush1.bf16.msra.mxu0 %v2294_v41  ;;  %1800 = vmatpush1.bf16.msra.mxu1 %v2297_v42  ;;  %v2397_v37 = vpop.eup %2396 }
 0x21d   :  { %1719 = vmatprep.subr.bf16.mxu0 %v2302_v44  ;;  %1801 = vmatprep.subr.bf16.mxu1 %v2305_v45  ;;  %v876_v41 = vmul.f32 %v2397_v37, %v2612_v10  ;;  %v1010_v44 = vld [vmem:[%s2644_s5] sm:$0xf]  ;;  %s2442_s5 = scalar_lea.vmem %s1847_s27, 512 }
 0x21e   :  { %v1015_v45 = vrot.slane %v1010_v44, %v828_v54  ;;  %v1019_v10 = vrot.slane %v1010_v44, %v832_v57  ;;  %p2443_p2 = scmp.ne.s32.totalorder %s1847_s27, %s2442_s5  ;;  %p2448_p4 = scmp.lt.s32.totalorder %s2442_s5, %s2442_s5 }
 0x21f   :  { %v880_v42 = vpack.c.bf16 %v876_v41, %v876_v41 }
 0x220   :  { %1720 = vmatpush1.bf16.msra.mxu0 %v2300_v46  ;;  %1802 = vmatpush1.bf16.msra.mxu1 %v2303_v47  ;;  %v1023_v46 = vrot.slane %v1010_v44, %v836_v55  ;;  %v1027_v47 = vrot.slane %v1010_v44, %v840_v58  ;;  %p2449_p5 = por %p2448_p4, %p2447_p3 }
 0x221   :  { %1721 = vmatprep.subr.bf16.mxu0 %v2308_v48  ;;  %1803 = vmatprep.subr.bf16.mxu1 %v2311_v49 }
 0x222   :  { %p2450_p6 = pnand %p2449_p5, %p2443_p2 }
 0x224   :  { %1722 = vmatpush1.bf16.msra.mxu0 %v2306_v50  ;;  %1804 = vmatpush1.bf16.msra.mxu1 %v2309_v38 }
 0x225   :  { %1723 = vmatprep.subr.bf16.mxu0 %v2314_v51  ;;  %1805 = vmatprep.subr.bf16.mxu1 %v2317_v52 }
 0x228   :  { %1724 = vmatpush1.bf16.msra.mxu0 %v2312_v56  ;;  %1806 = vmatpush1.bf16.msra.mxu1 %v2315_v59 }
 0x229   :  { %1725 = vmatprep.subr.bf16.mxu0 %v2320_v60  ;;  %1807 = vmatprep.subr.bf16.mxu1 %v2323_v61 }
 0x22c   :  { %1726 = vmatpush1.bf16.msra.mxu0 %v2318_v62  ;;  %1808 = vmatpush1.bf16.msra.mxu1 %v2321_v63 }
 0x22d   :  { %1727 = vmatprep.subr.bf16.mxu0 %v2326_v43  ;;  %1809 = vmatprep.subr.bf16.mxu1 %v2329_v1 }
 0x230   :  { %1728 = vmatpush1.bf16.msra.mxu0 %v2324_v3  ;;  %1810 = vmatpush1.bf16.msra.mxu1 %v2327_v4 }
 0x231   :  { %1729 = vmatprep.subr.bf16.mxu0 %v2332_v5  ;;  %1811 = vmatprep.subr.bf16.mxu1 %v2335_v6 }
 0x234   :  { %1730 = vmatpush1.bf16.msra.mxu0 %v2330_v7  ;;  %1812 = vmatpush1.bf16.msra.mxu1 %v2333_v8 }
 0x235   :  { %1731 = vmatprep.subr.bf16.mxu0 %v2338_v9  ;;  %1813 = vmatprep.subr.bf16.mxu1 %v2341_v11 }
 0x238   :  { %1732 = vmatpush1.bf16.msra.mxu0 %v2336_v12  ;;  %1814 = vmatpush1.bf16.msra.mxu1 %v2339_v13 }
 0x239   :  { %1733 = vmatprep.subr.bf16.mxu0 %v2344_v14  ;;  %1815 = vmatprep.subr.bf16.mxu1 %v2347_v15 }
 0x23c   :  { %1734 = vmatpush1.bf16.msra.mxu0 %v2342_v16  ;;  %1816 = vmatpush1.bf16.msra.mxu1 %v2345_v17 }
 0x23d   :  { %1735 = vmatprep.subr.bf16.mxu0 %v2350_v19  ;;  %1817 = vmatprep.subr.bf16.mxu1 %v2353_v20 }
 0x240   :  { %1736 = vmatpush1.bf16.msra.mxu0 %v2348_v0  ;;  %1818 = vmatpush1.bf16.msra.mxu1 %v2351_v22 }
 0x241   :  { %1737 = vmatprep.subr.bf16.mxu0 %v2356_v23  ;;  %1819 = vmatprep.subr.bf16.mxu1 %v2359_v24 }
 0x244   :  { %1738 = vmatpush1.bf16.msra.mxu0 %v2354_v25  ;;  %1820 = vmatpush1.bf16.msra.mxu1 %v2357_v26 }
 0x245   :  { %1739 = vmatprep.subr.bf16.mxu0 %v2362_v27  ;;  %1821 = vmatprep.subr.bf16.mxu1 %v2365_v28 }
 0x248   :  { %1740 = vmatpush1.bf16.msra.mxu0 %v2360_v29  ;;  %1822 = vmatpush1.bf16.msra.mxu1 %v2363_v30 }
 0x249   :  { %1741 = vmatprep.subr.bf16.mxu0 %v2368_v31  ;;  %1823 = vmatprep.subr.bf16.mxu1 %v2371_v32 }
 0x24c   :  { %1742 = vmatpush1.bf16.msra.mxu0 %v2366_v33  ;;  %1824 = vmatpush1.bf16.msra.mxu1 %v2369_v34 }
 0x24d   :  { %1743 = vmatprep.subr.bf16.mxu0 %v2374_v35  ;;  %1825 = vmatprep.subr.bf16.mxu1 %v2377_v36 }
 0x250   :  { %1744 = vmatpush1.bf16.msra.mxu0 %v2372_v39  ;;  %1826 = vmatpush1.bf16.msra.mxu1 %v2375_v40 }
 0x253   :  { %1746 = vmatmul.mubr.bf16.vlgmr.msra.gmra.mrb[8].mxu0 %v880_v42  ;;  %1828 = vmatmul.mubr.bf16.vlgmr.msra.gmra.mrb[8].mxu1 %v880_v42 }
 0x326   :  { %v1747_v48 = vpop.f32.mrb[8].mxu0  ;;  %v1829_v49 = vpop.f32.mrb[8].mxu1 }
 0x327   :  { %v2061_v50 = vadd.f32 %v1747_v48, %v1015_v45  ;;  %v2063_v38 = vadd.f32 %v1829_v49, %v1023_v46  ;;  %v1749_v51 = vpop.f32.mrb[9].mxu0  ;;  %v1831_v52 = vpop.f32.mrb[9].mxu1 }
 0x328   :  { %v2062_v56 = vadd.f32 %v1749_v51, %v1019_v10  ;;  %v2064_v59 = vadd.f32 %v1831_v52, %v1027_v47  ;;  %v1751_v54 = vpop.f32.mrb[10].mxu0  ;;  %v1833_v60 = vpop.f32.mrb[10].mxu1 }
 0x329   :  { %1836 = vst [vmem:[#allocation7] sm:$0xff] %v2061_v50  ;;  %1838 = vst [vmem:[#allocation7 + $0x10] sm:$0xff] %v2063_v38  ;;  %v1752_v55 = vpop.f32.mrb[11].mxu0  ;;  %v1834_v57 = vpop.f32.mrb[11].mxu1 }
 0x32a   :  { %1837 = vst [vmem:[#allocation7 + $0x8] sm:$0xff] %v2062_v56  ;;  %1839 = vst [vmem:[#allocation7 + $0x18] sm:$0xff] %v2064_v59 }
 0x32b   :  { %2453 = shalt.err (!%p2450_p6)
}
 0x32c   :  { %s2454_s30 = scalar_lea.hbm %s2645_s6, 512 }
 0x32d   :  { %p2455_p7 = scmp.ne.s32.totalorder %s2645_s6, %s2454_s30  ;;  %p2458_p8 = scmp.lt.u32.totalorder %s2454_s30, %s2645_s6 }
 0x32f   :  { %p2460_p9 = pnand %p2458_p8, %p2455_p7 }
 0x331   :  { %2463 = shalt.err (!%p2460_p9)
}
 0x332   :  { %1849 = dma.vmem_to_hbm [thread:$0]  %s1847_s27, 512, %s2645_s6, [#allocation4]  }
 0x333   :  { %2468 = dma.done.wait [#allocation4], 512  }
 0x334   :  { %2469 = vsyncadd [#allocation4], 4294966784 }
 0x335   :  { %1853 = vsyncpa [#allocation3], 1 }
 0x336   :  { %1854 = vsyncpa [#allocation6], 1 }
 0x337   :  { %1855 = vsyncpa [#allocation4], 1 }

</bundles_post_ra>
